<compile_context>
chip_gen: v6e
topology: v6e:2x2x1
jax: 0.10.0
libtpu: 0.0.40
codegen_flags: <defaults>
</compile_context>

<pallas_src>
import functools

import jax
import jax.numpy as jnp
from jax.experimental import pallas as pl
from jax.experimental.pallas import tpu as pltpu

_LANE = 128
_MIB = 1024 * 1024


def _round_up(x: int, m: int) -> int:
    return ((x + m - 1) // m) * m


def _round_down(x: int, m: int) -> int:
    return (x // m) * m


def _physical_vmem_bytes() -> int:
    """Per-core physical VMEM, with a conservative (v7x-sized) fallback."""
    cap = 64 * _MIB
    try:
        info = pltpu.get_tpu_info()
        cap = int(getattr(info, "vmem_capacity_bytes", cap)) or cap
    except Exception:
        pass
    return cap


def _rmsnorm_kernel(x_ref, w_ref, o_ref, *, eps: float, inv_hidden: float,
                    hidden: int, mask_hidden: bool):
    # x_ref: (tile_rows, hidden_p), w_ref: (1, hidden_p), o_ref: (tile_rows, hidden_p)
    x_f32 = x_ref[...].astype(jnp.float32)          # single widen, reused below
    if mask_hidden:
        # Block extends past the (unpadded) array in the lane dim: zero the
        # garbage lanes so the reduction is exact.  Edge stores are masked
        # automatically by Pallas.
        lane = jax.lax.broadcasted_iota(jnp.int32, x_f32.shape, 1)
        x_f32 = jnp.where(lane < hidden, x_f32, 0.0)
    # sum * (1/hidden) instead of mean so masked hidden columns are exact.
    variance = jnp.sum(x_f32 * x_f32, axis=-1, keepdims=True) * inv_hidden
    inv = jax.lax.rsqrt(variance + eps)
    h = x_f32 * inv
    w = w_ref[...]
    # torch: if weight is half precision, cast hidden_states to weight dtype first.
    if w.dtype in (jnp.float16, jnp.bfloat16):
        h = h.astype(w.dtype)
    o_ref[...] = (w * h).astype(o_ref.dtype)


def internlm_rmsnorm(x: jax.Array, weight: jax.Array, eps: float = 1e-6,
                     tile_rows: int | None = None) -> jax.Array:
    """RMSNorm over the last axis of x (InternLM / T5 semantics)."""
    orig_shape = x.shape
    hidden = orig_shape[-1]
    x2d = x.reshape(-1, hidden)
    rows = x2d.shape[0]

    # Output dtype follows torch semantics:
    #   half-precision weight -> weight dtype; otherwise promote with f32.
    if weight.dtype in (jnp.float16, jnp.bfloat16):
        out_dtype = jnp.dtype(weight.dtype)
    else:
        out_dtype = jnp.dtype(jnp.promote_types(weight.dtype, jnp.float32))

    in_itemsize = jnp.dtype(x.dtype).itemsize
    out_itemsize = out_dtype.itemsize
    w_itemsize = jnp.dtype(weight.dtype).itemsize
    # Sublane packing: 8 rows/vreg at 32-bit, 16 at 16-bit, 32 at 8-bit.
    row_align = 8 * (4 // min(in_itemsize, out_itemsize, 4))

    hidden_p = _round_up(hidden, _LANE)       # lane-aligned block width
    mask_hidden = hidden_p != hidden

    # Only the tiny weight is padded (one hidden-sized copy); x/out stay unpadded.
    w2d = weight.reshape(1, hidden)
    if mask_hidden:
        w2d = jnp.pad(w2d, ((0, 0), (0, hidden_p - hidden)))

    # Per-row VMEM footprint: double-buffered in+out blocks plus the in-kernel
    # f32 intermediates (x_f32 and h, ~8 B/elem, single-buffered).
    block_bytes_per_row = hidden_p * (2 * (in_itemsize + out_itemsize) + 8)

    if tile_rows is None:
        # Byte target: ~8 MiB of input block per grid step (amortizes the
        # ~0.35 us per-step overhead without over-sizing wide-hidden cases).
        target = max(row_align, (8 * _MIB) // (hidden_p * in_itemsize))
        # VMEM budget for our buffers: half of physical, capped at 48 MiB.
        budget = min(_physical_vmem_bytes() // 2, 48 * _MIB)
        vmem_cap = max(row_align, budget // block_bytes_per_row)
        tile_rows = min(target, vmem_cap)
        # Guarantee >= 4 grid steps whenever rows allow it: prefetch/writeback
        # overlap everywhere, plus both v7x TensorCores get work.
        if rows >= 4 * row_align:
            tile_rows = min(tile_rows, max(row_align, rows // 4))
    tile_rows = int(min(int(tile_rows), _round_up(rows, row_align)))
    tile_rows = max(row_align, _round_down(tile_rows, row_align))

    grid = (pl.cdiv(rows, tile_rows),)

    # Scoped-VMEM limit: blocks + f32 temps + weight + headroom, floored at the
    # 32 MiB default, capped at physical VMEM minus 8 MiB (v7x-safe).
    need = tile_rows * block_bytes_per_row + 2 * hidden_p * w_itemsize
    vmem_limit = int(min(max(need + 8 * _MIB, 32 * _MIB),
                         _physical_vmem_bytes() - 8 * _MIB))

    cost = pl.CostEstimate(
        flops=int(4 * rows * hidden),
        transcendentals=int(rows),
        bytes_accessed=int(rows * hidden * (in_itemsize + out_itemsize)
                           + hidden * w_itemsize),
    )

    out = pl.pallas_call(
        functools.partial(_rmsnorm_kernel, eps=float(eps),
                          inv_hidden=1.0 / hidden, hidden=hidden,
                          mask_hidden=mask_hidden),
        out_shape=jax.ShapeDtypeStruct((rows, hidden), out_dtype),
        grid_spec=pltpu.PrefetchScalarGridSpec(
            num_scalar_prefetch=0,
            grid=grid,
            in_specs=[
                pl.BlockSpec((tile_rows, hidden_p), lambda i: (i, 0)),
                pl.BlockSpec((1, hidden_p), lambda i: (0, 0)),
            ],
            out_specs=pl.BlockSpec((tile_rows, hidden_p), lambda i: (i, 0)),
        ),
        compiler_params=pltpu.CompilerParams(
            dimension_semantics=("parallel",),
            vmem_limit_bytes=vmem_limit,
        ),
        cost_estimate=cost,
    )(x2d, w2d)

    return out.reshape(orig_shape)


if __name__ == "__main__":
    key = jax.random.PRNGKey(0)
    batch, seq, hidden = 2, 8, 32
    eps = 1e-6

    x = jax.random.normal(key, (batch, seq, hidden), dtype=jnp.float32)
    # Module __init__: weight = ones(hidden_size)
    weight = jnp.ones((hidden,), dtype=jnp.float32)

    out = internlm_rmsnorm(x, weight, eps=eps)
    out = jax.block_until_ready(out)

    # Reference check (plain JAX, mirrors torch semantics)
    x32 = x.astype(jnp.float32)
    var = jnp.mean(x32 * x32, axis=-1, keepdims=True)
    ref = weight * (x32 * jax.lax.rsqrt(var + eps))
    assert out.shape == ref.shape and out.dtype == ref.dtype
    assert jnp.allclose(out, ref, atol=1e-5, rtol=1e-5)

    print("KERNEL_OK")
</pallas_src>

<mosaic_0001>
module attributes {stable_mosaic.version = 11 : i64} {
  func.func @_rmsnorm_kernel(%arg0: i32, %arg1: memref<16x128xf32, #tpu.memory_space<vmem>>, %arg2: memref<1x128xf32, #tpu.memory_space<vmem>>, %arg3: memref<16x128xf32, #tpu.memory_space<vmem>>) attributes {dimension_semantics = [#tpu.dimension_semantics<parallel>], iteration_bounds = array<i64: 1>, scalar_prefetch = 0 : i64, scratch_operands = 0 : i64, tpu.core_type = #tpu.core_type<tc>, window_params = [{transform_indices = @transform_0, window_bounds = array<i64: 16, 128>}, {pipeline_mode = #tpu.pipeline_mode<synchronous>, transform_indices = @transform_1, window_bounds = array<i64: 1, 128>}, {transform_indices = @transform_2, window_bounds = array<i64: 16, 128>}]} {
    %c0 = arith.constant 0 : index
    %c0_0 = arith.constant 0 : index
    %0 = vector.load %arg1[%c0, %c0_0] : memref<16x128xf32, #tpu.memory_space<vmem>>, vector<16x128xf32>
    %1 = tpu.iota {dimensions = array<i32: 1>} : vector<16x128xi32>
    %c32_i32 = arith.constant 32 : i32
    %2 = vector.broadcast %c32_i32 : i32 to vector<16x128xi32>
    %3 = arith.cmpi slt, %1, %2 : vector<16x128xi32>
    %cst = arith.constant 0.000000e+00 : f32
    %4 = vector.broadcast %cst : f32 to vector<16x128xf32>
    %5 = arith.select %3, %0, %4 : vector<16x128xi1>, vector<16x128xf32>
    %6 = arith.mulf %5, %5 : vector<16x128xf32>
    %cst_1 = arith.constant dense<0.000000e+00> : vector<16xf32>
    %7 = vector.multi_reduction <add>, %6, %cst_1 [1] : vector<16x128xf32> to vector<16xf32>
    %8 = vector.shape_cast %7 : vector<16xf32> to vector<16x1xf32>
    %cst_2 = arith.constant 3.125000e-02 : f32
    %9 = vector.broadcast %cst_2 : f32 to vector<16x1xf32>
    %10 = arith.mulf %8, %9 : vector<16x1xf32>
    %cst_3 = arith.constant 9.99999997E-7 : f32
    %11 = vector.broadcast %cst_3 : f32 to vector<16x1xf32>
    %12 = arith.addf %10, %11 : vector<16x1xf32>
    %13 = math.rsqrt %12 : vector<16x1xf32>
    %14 = vector.broadcast %13 : vector<16x1xf32> to vector<16x128xf32>
    %15 = arith.mulf %5, %14 : vector<16x128xf32>
    %c0_4 = arith.constant 0 : index
    %c0_5 = arith.constant 0 : index
    %16 = vector.load %arg2[%c0_4, %c0_5] : memref<1x128xf32, #tpu.memory_space<vmem>>, vector<1x128xf32>
    %17 = vector.broadcast %16 : vector<1x128xf32> to vector<16x128xf32>
    %18 = arith.mulf %17, %15 : vector<16x128xf32>
    %c0_6 = arith.constant 0 : index
    %c0_7 = arith.constant 0 : index
    %19 = vector.load %arg3[%c0_6, %c0_7] : memref<16x128xf32, #tpu.memory_space<vmem>>, vector<16x128xf32>
    tpu.vector_store %arg3[%c0_6, %c0_7], %18 {strides = array<i32>} : memref<16x128xf32, #tpu.memory_space<vmem>>, vector<16x128xf32>,
    return
  }
  func.func @transform_0(%arg0: i32) -> (i32, i32) {
    %c0_i32 = arith.constant 0 : i32
    %c0_i32_0 = arith.constant 0 : i32
    return %arg0, %c0_i32 : i32, i32
  }
  func.func @transform_1(%arg0: i32) -> (i32, i32) {
    %c0_i32 = arith.constant 0 : i32
    %c0_i32_0 = arith.constant 0 : i32
    %c0_i32_1 = arith.constant 0 : i32
    return %c0_i32, %c0_i32_0 : i32, i32
  }
  func.func @transform_2(%arg0: i32) -> (i32, i32) {
    %c0_i32 = arith.constant 0 : i32
    %c0_i32_0 = arith.constant 0 : i32
    return %arg0, %c0_i32 : i32, i32
  }
}

</mosaic_0001>

<bundles_post_ra>
// kernel: tpu_custom_call.1
= control target key start
LH: loop header
LB: loop body
LE: loop exit
PB: predicated region body
PF: predicated region fallthrough
CT: control target
= control target key end

     0   :  { %7 = vsyncpa [#allocation3], 0  ;;  %s162_s0 = inlined_call_operand.hbm [shape: f32[16,32], index: 0, kind: input, shape index: {}]   ;;  %s163_s1 = inlined_call_operand.vmem [shape: f32[1,128], index: 1, kind: input, shape index: {}]   ;;  %s164_s2 = inlined_call_operand.hbm [shape: f32[16,32], index: 2, kind: output, shape index: {}]  }
   0x1   :  { %8 = vsyncpa [#allocation4], 0  ;;  %s128_s9 = smov [#allocation2]  }
   0x2   :  { %s14_s10 = sshll.u32 %s128_s9, 4  ;;  %s15_s10 = int_to_ptr.vmem [resolvable:$true] %s14_s10 }
   0x3   :  { %s92_s11 = scalar_lea.vmem %s15_s10, 256  ;;  %p97_p1 = scmp.lt.s32.totalorder %s15_s10, %s15_s10 }
   0x4   :  { %p93_p0 = scmp.ne.s32.totalorder %s15_s10, %s92_s11  ;;  %p98_p2 = scmp.lt.s32.totalorder %s92_s11, %s92_s11 }
   0x6   :  { %p99_p3 = por %p98_p2, %p97_p1 }
   0x8   :  { %p100_p4 = pnand %p99_p3, %p93_p0 }
   0xa   :  { %103 = shalt.err (!%p100_p4)
}
   0xb   :  { %s129_s12 = smov 128   ;;  %s130_s13 = smov 8  }
   0xc   :  { %20 = dma.hbm_to_vmem [thread:$0]  %s162_s0, 256, %s15_s10, [#allocation3], %s129_s12, %s129_s12, %s130_s13  }
   0xd   :  { %124 = dma.done.wait [#allocation3], 256  }
   0xe   :  { %125 = vsyncadd [#allocation3], 4294967040  ;;  %v28_v0 = vlaneseq  ;;  %v26_v2 = vld [vmem:[#allocation2] sm:$0xff]  ;;  %v27_v3 = vld [vmem:[#allocation2 + $0x8] sm:$0xff]  ;;  %s131_s17 = smov [#allocation5]  }
   0xf   :  { %v75_v15 = vld [vmem:[%s163_s1] ss:$0 sm:$0xff]  ;;  %s63_s18 = sshll.u32 %s131_s17, 4  ;;  %s64_s18 = int_to_ptr.vmem [resolvable:$true] %s63_s18 }
  0x10   :  { %v29_v1 = vand.u32 127, %v28_v0  ;;  %s104_s19 = scalar_lea.vmem %s64_s18, 256  ;;  %p109_p6 = scmp.lt.s32.totalorder %s64_s18, %s64_s18 }
  0x11   :  { %p105_p5 = scmp.ne.s32.totalorder %s64_s18, %s104_s19  ;;  %p110_p7 = scmp.lt.s32.totalorder %s104_s19, %s104_s19 }
  0x12   :  { %vm30_vm0 = vcmp.lt.s32.totalorder %v29_v1, 32 }
  0x13   :  { %v31_v4 = vsel %vm30_vm0, %v26_v2, 0.0  ;;  %v32_v5 = vsel %vm30_vm0, %v27_v3, 0.0  ;;  %p111_p8 = por %p110_p7, %p109_p6 }
  0x14   :  { %v33_v6 = vmul.f32 %v31_v4, %v31_v4  ;;  %v34_v7 = vmul.f32 %v32_v5, %v32_v5 }
  0x15   :  { %p112_p9 = pnand %p111_p8, %p105_p5 }
  0x16   :  { %35 = vadd.xlane.f32.xlu0 %v33_v6 }
  0x1a   :  { %37 = vadd.xlane.f32.xlu0 %v34_v7 }
  0x9f   :  { %v36_v8 = vpop.xlane.xlu0 %35 }
  0xa0   :  { %v39_v9 = vmul.f32 0.03125, %v36_v8 }
  0xa2   :  { %v41_v10 = vadd.f32 1e-06, %v39_v9 }
  0xa3   :  { %v38_v11 = vpop.xlane.xlu0 %37 }
  0xa4   :  { %80 = vrsqrt.f32 %v41_v10  ;;  %v40_v12 = vmul.f32 0.03125, %v38_v11 }
  0xa6   :  { %v42_v13 = vadd.f32 1e-06, %v40_v12 }
  0xa8   :  { %82 = vrsqrt.f32 %v42_v13 }
  0xb1   :  { %v81_v14 = vpop.eup %80 }
  0xb2   :  { %v45_v16 = vmul.f32 %v81_v14, %v31_v4 }
  0xb4   :  { %v54_v17 = vmul.f32 %v75_v15, %v45_v16 }
  0xb5   :  { %v83_v18 = vpop.eup %82 }
  0xb6   :  { %v46_v19 = vmul.f32 %v83_v18, %v32_v5  ;;  %56 = vst [vmem:[#allocation5] sm:$0xff] %v54_v17 }
  0xb8   :  { %v55_v20 = vmul.f32 %v75_v15, %v46_v19 }
  0xba   :  { %57 = vst [vmem:[#allocation5 + $0x8] sm:$0xff] %v55_v20 }
  0xbb   :  { %115 = shalt.err (!%p112_p9)
}
  0xbc   :  { %69 = dma.vmem_to_hbm [thread:$0]  %s64_s18, 256, %s164_s2, [#allocation4], %s129_s12, %s129_s12, %s130_s13  }
  0xbd   :  { %126 = dma.done.wait [#allocation4], 256  }
  0xbe   :  { %127 = vsyncadd [#allocation4], 4294967040 }
  0xbf   :  { %73 = vsyncpa [#allocation3], 1 }
  0xc0   :  { %74 = vsyncpa [#allocation4], 1 }

</bundles_post_ra>
